<compile_context>
chip_gen: v7x
topology: tpu7x:2x2x1
jax: 0.10.0
libtpu: 0.0.40
codegen_flags: <defaults>
</compile_context>

<pallas_src>
import functools
import math
from typing import NamedTuple

import jax
import jax.numpy as jnp
from jax import lax
from jax.experimental import pallas as pl
from jax.experimental.pallas import tpu as pltpu


def _round_up(x, m):
    return (x + m - 1) // m * m


def _pad2d(a, rows, cols):
    r, c = a.shape
    if r == rows and c == cols:
        return a
    return jnp.pad(a, ((0, rows - r), (0, cols - c)))


def _sublane_align(dtype):
    return {4: 8, 2: 16, 1: 32}.get(jnp.dtype(dtype).itemsize, 8)


class LMHeadParams(NamedTuple):
    wt_t: jax.Array    # (Hp, Hp) transform weight, pre-transposed to (in, out), compute dtype
    bt: jax.Array      # (1, Hp)  transform bias, f32
    gamma: jax.Array   # (1, Hp)  LayerNorm weight, f32
    beta: jax.Array    # (1, Hp)  LayerNorm bias, f32
    wd_t: jax.Array    # (Hp, Vp) tied-embedding decoder weight, pre-transposed, compute dtype
    bd: jax.Array      # (1, Vp)  decoder bias, f32
    h_true: int        # true hidden size H
    v_true: int        # true vocab size V
    tv: int            # vocab tile width (multiple of 128, divides Vp)


def prepare_lm_head_params(t_weight, t_bias, ln_gamma, ln_beta, dec_weight, dec_bias,
                           *, compute_dtype=jnp.bfloat16, tv_max=512):
    """One-time prep: pad, pre-transpose to (K, N) layout, cast weights to compute dtype."""
    H = t_weight.shape[0]
    V, Hd = dec_weight.shape
    assert Hd == H

    Hp = _round_up(H, 128)
    tv = min(_round_up(tv_max, 128), _round_up(V, 128))
    Vp = _round_up(V, tv)

    wt_t = _pad2d(t_weight, Hp, Hp).T.astype(compute_dtype)      # (in, out)
    wd_t = _pad2d(dec_weight, Vp, Hp).T.astype(compute_dtype)    # (Hp, Vp)
    bt = _pad2d(t_bias.astype(jnp.float32).reshape(1, -1), 1, Hp)
    gamma = _pad2d(ln_gamma.astype(jnp.float32).reshape(1, -1), 1, Hp)
    beta = _pad2d(ln_beta.astype(jnp.float32).reshape(1, -1), 1, Hp)
    bd = _pad2d(dec_bias.astype(jnp.float32).reshape(1, -1), 1, Vp)
    return LMHeadParams(wt_t, bt, gamma, beta, wd_t, bd, H, V, tv)


def _lm_head_kernel(x_ref, wt_ref, bt_ref, gamma_ref, beta_ref,
                    wd_ref, bd_ref, o_ref, h_scratch, *, h_true, eps):
    # x_ref:     (tm, Hp)   activations tile (compute dtype)
    # wt_ref:    (Hp, Hp)   transform weight, (in, out) layout, VMEM-resident
    # bt/gamma/beta: (1, Hp) f32, VMEM-resident
    # wd_ref:    (Hp, tv)   decoder weight tile, (in, out) layout
    # bd_ref:    (1, tv)    decoder bias tile (f32)
    # o_ref:     (tm, tv)   output tile
    # h_scratch: (tm, Hp)   transformed activations for this M tile (compute dtype)
    j = pl.program_id(1)

    @pl.when(j == 0)
    def _transform():
        h = jnp.dot(x_ref[...], wt_ref[...], preferred_element_type=jnp.float32)
        h = h + bt_ref[...]

        # Exact-erf GELU (matches the PyTorch reference activation).
        inv_sqrt2 = jnp.float32(1.0 / math.sqrt(2.0))
        h = h * 0.5 * (1.0 + lax.erf(h * inv_sqrt2))

        # LayerNorm over the *true* hidden size (padded columns of h are exactly 0
        # through zero-padded weights/bias, so the /h_true mean is already correct;
        # the mask only keeps padded columns out of the variance).
        hp = h.shape[-1]
        inv_h = jnp.float32(1.0 / h_true)
        mean = jnp.sum(h, axis=-1, keepdims=True) * inv_h
        centered = h - mean
        if hp != h_true:
            col_mask = (lax.broadcasted_iota(jnp.int32, (1, hp), 1) < h_true
                        ).astype(jnp.float32)
            centered = centered * col_mask
        var = jnp.sum(centered * centered, axis=-1, keepdims=True) * inv_h
        inv_std = lax.rsqrt(var + jnp.float32(eps))
        normed = centered * inv_std * gamma_ref[...] + beta_ref[...]
        # Single cast per M tile into the decoder compute dtype.
        h_scratch[...] = normed.astype(h_scratch.dtype)

    # Decoder tile: (tm, Hp) @ (Hp, tv) + bias, f32 accumulation on the MXU.
    out = jnp.dot(h_scratch[...], wd_ref[...], preferred_element_type=jnp.float32)
    o_ref[...] = (out + bd_ref[...]).astype(o_ref.dtype)


def bert_lm_prediction_head(hidden_states, params: LMHeadParams, *,
                            tm_max=512, ln_eps=1e-12, out_dtype=None, unpad=True):
    """Fused BertLMPredictionHead forward.

    hidden_states: (B, S, H);  params from prepare_lm_head_params.
    Returns (B, S, V) (or (B, S, Vp) padded logits when unpad=False).
    """
    B, S, H = hidden_states.shape
    assert H == params.h_true
    V = params.v_true
    M = B * S

    compute_dtype = params.wd_t.dtype
    out_dtype = out_dtype if out_dtype is not None else compute_dtype

    Hp = params.wt_t.shape[0]
    Vp = params.wd_t.shape[1]
    tv = params.tv

    m_align = _sublane_align(compute_dtype)
    tm = max(m_align, min(_round_up(tm_max, m_align), _round_up(M, m_align)))
    Mp = _round_up(M, tm)

    x2 = _pad2d(hidden_states.reshape(M, H).astype(compute_dtype), Mp, Hp)

    grid = (Mp // tm, Vp // tv)
    kernel = functools.partial(_lm_head_kernel, h_true=H, eps=ln_eps)

    c_it = jnp.dtype(compute_dtype).itemsize
    o_it = jnp.dtype(out_dtype).itemsize
    num_m_tiles = Mp // tm

    # Real streamed traffic: decoder weight + bias re-read once per M tile.
    cost = pl.CostEstimate(
        flops=2 * Mp * Hp * Hp + 2 * Mp * Hp * Vp,
        transcendentals=Mp * Hp,
        bytes_accessed=int(Mp * Hp * c_it                      # x read once
                           + Hp * Hp * c_it + 3 * Hp * 4       # resident transform/LN params
                           + num_m_tiles * (Hp * Vp * c_it + Vp * 4)  # decoder weight/bias streams
                           + Mp * Vp * o_it),                  # logits writeback
    )

    # Double-buffered working set (resident operands are single-buffered).
    vmem_need = (2 * tm * Hp * c_it          # x tile
                 + Hp * Hp * c_it            # transform weight (Buffered(1))
                 + 3 * Hp * 4                # bt / gamma / beta (Buffered(1))
                 + 2 * Hp * tv * c_it        # decoder weight tile
                 + 2 * tv * 4                # decoder bias tile
                 + 2 * tm * tv * o_it        # output tile
                 + tm * Hp * c_it)           # h_scratch
    vmem_limit = int(min(64 << 20, vmem_need + vmem_need // 2 + (2 << 20)))

    resident = dict(pipeline_mode=pl.Buffered(1))

    out = pl.pallas_call(
        kernel,
        out_shape=jax.ShapeDtypeStruct((Mp, Vp), out_dtype),
        grid_spec=pltpu.PrefetchScalarGridSpec(
            num_scalar_prefetch=0,
            grid=grid,
            in_specs=[
                pl.BlockSpec((tm, Hp), lambda i, j: (i, 0)),             # x tile
                pl.BlockSpec((Hp, Hp), lambda i, j: (0, 0), **resident),  # transform W (resident)
                pl.BlockSpec((1, Hp), lambda i, j: (0, 0), **resident),   # transform bias
                pl.BlockSpec((1, Hp), lambda i, j: (0, 0), **resident),   # LN gamma
                pl.BlockSpec((1, Hp), lambda i, j: (0, 0), **resident),   # LN beta
                pl.BlockSpec((Hp, tv), lambda i, j: (0, j)),              # decoder W tile
                pl.BlockSpec((1, tv), lambda i, j: (0, j)),               # decoder bias tile
            ],
            out_specs=pl.BlockSpec((tm, tv), lambda i, j: (i, j)),
            scratch_shapes=[pltpu.VMEM((tm, Hp), compute_dtype)],
        ),
        compiler_params=pltpu.CompilerParams(
            dimension_semantics=("parallel", "arbitrary"),
            vmem_limit_bytes=vmem_limit),
        cost_estimate=cost,
    )(x2, params.wt_t, params.bt, params.gamma, params.beta, params.wd_t, params.bd)

    if unpad:
        if Mp != M or Vp != V:
            out = out[:M, :V]
        return out.reshape(B, S, V)
    # Padded-vocab return path (avoids the full-logits re-read/write slice);
    # downstream must mask the zero-padded vocab columns.
    if Mp != M:
        out = out[:M]
    return out.reshape(B, S, Vp)


if __name__ == "__main__":
    # Small config consistent with the module: hidden_size=32, vocab (embedding rows)=80.
    B, S, H, V = 2, 8, 32, 80

    key = jax.random.PRNGKey(0)
    ks = jax.random.split(key, 7)
    hidden_states = jax.random.normal(ks[0], (B, S, H), dtype=jnp.float32)
    t_weight = jax.random.normal(ks[1], (H, H), dtype=jnp.float32) / math.sqrt(H)
    t_bias = 0.02 * jax.random.normal(ks[2], (H,), dtype=jnp.float32)
    ln_gamma = 1.0 + 0.1 * jax.random.normal(ks[3], (H,), dtype=jnp.float32)
    ln_beta = 0.1 * jax.random.normal(ks[4], (H,), dtype=jnp.float32)
    dec_weight = jax.random.normal(ks[5], (V, H), dtype=jnp.float32) / math.sqrt(H)
    dec_bias = 0.02 * jax.random.normal(ks[6], (V,), dtype=jnp.float32)

    # Pure-JAX reference of the PyTorch forward.
    h = hidden_states @ t_weight.T + t_bias
    h = h * 0.5 * (1.0 + lax.erf(h / jnp.sqrt(2.0)))
    mean = h.mean(axis=-1, keepdims=True)
    var = jnp.mean((h - mean) ** 2, axis=-1, keepdims=True)
    h = (h - mean) / jnp.sqrt(var + 1e-12) * ln_gamma + ln_beta
    ref = h @ dec_weight.T + dec_bias

    # f32 path: exact-match check against the reference.
    params_f32 = prepare_lm_head_params(t_weight, t_bias, ln_gamma, ln_beta,
                                        dec_weight, dec_bias,
                                        compute_dtype=jnp.float32)
    out_f32 = bert_lm_prediction_head(hidden_states, params_f32)
    out_f32 = jax.block_until_ready(out_f32)
    assert out_f32.shape == (B, S, V)
    err = float(jnp.max(jnp.abs(out_f32 - ref)))
    assert jnp.allclose(out_f32, ref, atol=1e-4, rtol=1e-4), f"f32 max abs err = {err}"

    # bf16 streaming path (production default): loose tolerance vs f32 reference.
    params_bf16 = prepare_lm_head_params(t_weight, t_bias, ln_gamma, ln_beta,
                                         dec_weight, dec_bias,
                                         compute_dtype=jnp.bfloat16)
    out_bf16 = bert_lm_prediction_head(hidden_states, params_bf16)
    out_bf16 = jax.block_until_ready(out_bf16)
    assert out_bf16.shape == (B, S, V)
    err_bf16 = float(jnp.max(jnp.abs(out_bf16.astype(jnp.float32) - ref)))
    assert jnp.allclose(out_bf16.astype(jnp.float32), ref, atol=0.3, rtol=0.05), \
        f"bf16 max abs err = {err_bf16}"

    print("KERNEL_OK")
</pallas_src>

<mosaic_0001>
module attributes {stable_mosaic.version = 11 : i64} {
  func.func @_lm_head_kernel(%arg0: i32, %arg1: i32, %arg2: memref<16x128xf32, #tpu.memory_space<vmem>>, %arg3: memref<128x128xf32, #tpu.memory_space<vmem>>, %arg4: memref<1x128xf32, #tpu.memory_space<vmem>>, %arg5: memref<1x128xf32, #tpu.memory_space<vmem>>, %arg6: memref<1x128xf32, #tpu.memory_space<vmem>>, %arg7: memref<128x128xf32, #tpu.memory_space<vmem>>, %arg8: memref<1x128xf32, #tpu.memory_space<vmem>>, %arg9: memref<16x128xf32, #tpu.memory_space<vmem>>, %arg10: memref<16x128xf32, #tpu.memory_space<vmem>>) attributes {dimension_semantics = [#tpu.dimension_semantics<parallel>, #tpu.dimension_semantics<arbitrary>], iteration_bounds = array<i64: 1, 1>, scalar_prefetch = 0 : i64, scratch_operands = 1 : i64, tpu.core_type = #tpu.core_type<tc>, window_params = [{transform_indices = @transform_0, window_bounds = array<i64: 16, 128>}, {pipeline_mode = #tpu.pipeline_mode<synchronous>, transform_indices = @transform_1, window_bounds = array<i64: 128, 128>}, {pipeline_mode = #tpu.pipeline_mode<synchronous>, transform_indices = @transform_2, window_bounds = array<i64: 1, 128>}, {pipeline_mode = #tpu.pipeline_mode<synchronous>, transform_indices = @transform_3, window_bounds = array<i64: 1, 128>}, {pipeline_mode = #tpu.pipeline_mode<synchronous>, transform_indices = @transform_4, window_bounds = array<i64: 1, 128>}, {transform_indices = @transform_5, window_bounds = array<i64: 128, 128>}, {transform_indices = @transform_6, window_bounds = array<i64: 1, 128>}, {transform_indices = @transform_7, window_bounds = array<i64: 16, 128>}]} {
    %c0_i32 = arith.constant 0 : i32
    %0 = arith.cmpi eq, %arg1, %c0_i32 : i32
    %1 = arith.extui %0 : i1 to i32
    %c0_i32_0 = arith.constant 0 : i32
    %2 = arith.cmpi ne, %1, %c0_i32_0 : i32
    scf.if %2 {
      %c0_8 = arith.constant 0 : index
      %c0_9 = arith.constant 0 : index
      %10 = vector.load %arg2[%c0_8, %c0_9] : memref<16x128xf32, #tpu.memory_space<vmem>>, vector<16x128xf32>
      %c0_10 = arith.constant 0 : index
      %c0_11 = arith.constant 0 : index
      %11 = vector.load %arg3[%c0_10, %c0_11] : memref<128x128xf32, #tpu.memory_space<vmem>>, vector<128x128xf32>
      %cst_12 = arith.constant dense<0.000000e+00> : vector<16x128xf32>
      %12 = tpu.matmul %10, %11, %cst_12 {dimension_numbers = #tpu.dot_dimension_numbers<[1], [0], [0], [1], [0, 0, 1, 1], [], []>} : vector<16x128xf32>, vector<128x128xf32>, vector<16x128xf32> -> vector<16x128xf32>
      %c0_13 = arith.constant 0 : index
      %c0_14 = arith.constant 0 : index
      %13 = vector.load %arg4[%c0_13, %c0_14] : memref<1x128xf32, #tpu.memory_space<vmem>>, vector<1x128xf32>
      %14 = vector.broadcast %13 : vector<1x128xf32> to vector<16x128xf32>
      %15 = arith.addf %12, %14 : vector<16x128xf32>
      %cst_15 = arith.constant 5.000000e-01 : f32
      %16 = vector.broadcast %cst_15 : f32 to vector<16x128xf32>
      %17 = arith.mulf %15, %16 : vector<16x128xf32>
      %cst_16 = arith.constant 0.707106769 : f32
      %18 = vector.broadcast %cst_16 : f32 to vector<16x128xf32>
      %19 = arith.mulf %15, %18 : vector<16x128xf32>
      %20 = math.erf %19 : vector<16x128xf32>
      %cst_17 = arith.constant 1.000000e+00 : f32
      %21 = vector.broadcast %cst_17 : f32 to vector<16x128xf32>
      %22 = arith.addf %21, %20 : vector<16x128xf32>
      %23 = arith.mulf %17, %22 : vector<16x128xf32>
      %cst_18 = arith.constant dense<0.000000e+00> : vector<16xf32>
      %24 = vector.multi_reduction <add>, %23, %cst_18 [1] : vector<16x128xf32> to vector<16xf32>
      %25 = vector.shape_cast %24 : vector<16xf32> to vector<16x1xf32>
      %cst_19 = arith.constant 3.125000e-02 : f32
      %26 = vector.broadcast %cst_19 : f32 to vector<16x1xf32>
      %27 = arith.mulf %25, %26 : vector<16x1xf32>
      %28 = vector.broadcast %27 : vector<16x1xf32> to vector<16x128xf32>
      %29 = arith.subf %23, %28 : vector<16x128xf32>
      %30 = tpu.iota {dimensions = array<i32: 1>} : vector<1x128xi32>
      %c32_i32 = arith.constant 32 : i32
      %31 = vector.broadcast %c32_i32 : i32 to vector<1x128xi32>
      %32 = arith.cmpi slt, %30, %31 : vector<1x128xi32>
      %33 = arith.extui %32 : vector<1x128xi1> to vector<1x128xi32>
      %34 = arith.sitofp %33 : vector<1x128xi32> to vector<1x128xf32>
      %35 = vector.broadcast %34 : vector<1x128xf32> to vector<16x128xf32>
      %36 = arith.mulf %29, %35 : vector<16x128xf32>
      %37 = arith.mulf %36, %36 : vector<16x128xf32>
      %cst_20 = arith.constant dense<0.000000e+00> : vector<16xf32>
      %38 = vector.multi_reduction <add>, %37, %cst_20 [1] : vector<16x128xf32> to vector<16xf32>
      %39 = vector.shape_cast %38 : vector<16xf32> to vector<16x1xf32>
      %cst_21 = arith.constant 3.125000e-02 : f32
      %40 = vector.broadcast %cst_21 : f32 to vector<16x1xf32>
      %41 = arith.mulf %39, %40 : vector<16x1xf32>
      %cst_22 = arith.constant 9.99999996E-13 : f32
      %42 = vector.broadcast %cst_22 : f32 to vector<16x1xf32>
      %43 = arith.addf %41, %42 : vector<16x1xf32>
      %44 = math.rsqrt %43 : vector<16x1xf32>
      %45 = vector.broadcast %44 : vector<16x1xf32> to vector<16x128xf32>
      %46 = arith.mulf %36, %45 : vector<16x128xf32>
      %c0_23 = arith.constant 0 : index
      %c0_24 = arith.constant 0 : index
      %47 = vector.load %arg5[%c0_23, %c0_24] : memref<1x128xf32, #tpu.memory_space<vmem>>, vector<1x128xf32>
      %48 = vector.broadcast %47 : vector<1x128xf32> to vector<16x128xf32>
      %49 = arith.mulf %46, %48 : vector<16x128xf32>
      %c0_25 = arith.constant 0 : index
      %c0_26 = arith.constant 0 : index
      %50 = vector.load %arg6[%c0_25, %c0_26] : memref<1x128xf32, #tpu.memory_space<vmem>>, vector<1x128xf32>
      %51 = vector.broadcast %50 : vector<1x128xf32> to vector<16x128xf32>
      %52 = arith.addf %49, %51 : vector<16x128xf32>
      %c0_27 = arith.constant 0 : index
      %c0_28 = arith.constant 0 : index
      %53 = vector.load %arg10[%c0_27, %c0_28] : memref<16x128xf32, #tpu.memory_space<vmem>>, vector<16x128xf32>
      tpu.vector_store %arg10[%c0_27, %c0_28], %52 {strides = array<i32>} : memref<16x128xf32, #tpu.memory_space<vmem>>, vector<16x128xf32>,
    } else {
    }
    %c0 = arith.constant 0 : index
    %c0_1 = arith.constant 0 : index
    %3 = vector.load %arg10[%c0, %c0_1] : memref<16x128xf32, #tpu.memory_space<vmem>>, vector<16x128xf32>
    %c0_2 = arith.constant 0 : index
    %c0_3 = arith.constant 0 : index
    %4 = vector.load %arg7[%c0_2, %c0_3] : memref<128x128xf32, #tpu.memory_space<vmem>>, vector<128x128xf32>
    %cst = arith.constant dense<0.000000e+00> : vector<16x128xf32>
    %5 = tpu.matmul %3, %4, %cst {dimension_numbers = #tpu.dot_dimension_numbers<[1], [0], [0], [1], [0, 0, 1, 1], [], []>} : vector<16x128xf32>, vector<128x128xf32>, vector<16x128xf32> -> vector<16x128xf32>
    %c0_4 = arith.constant 0 : index
    %c0_5 = arith.constant 0 : index
    %6 = vector.load %arg8[%c0_4, %c0_5] : memref<1x128xf32, #tpu.memory_space<vmem>>, vector<1x128xf32>
    %7 = vector.broadcast %6 : vector<1x128xf32> to vector<16x128xf32>
    %8 = arith.addf %5, %7 : vector<16x128xf32>
    %c0_6 = arith.constant 0 : index
    %c0_7 = arith.constant 0 : index
    %9 = vector.load %arg9[%c0_6, %c0_7] : memref<16x128xf32, #tpu.memory_space<vmem>>, vector<16x128xf32>
    tpu.vector_store %arg9[%c0_6, %c0_7], %8 {strides = array<i32>} : memref<16x128xf32, #tpu.memory_space<vmem>>, vector<16x128xf32>,
    return
  }
  func.func @transform_0(%arg0: i32, %arg1: i32) -> (i32, i32) {
    %c0_i32 = arith.constant 0 : i32
    %c0_i32_0 = arith.constant 0 : i32
    return %arg0, %c0_i32 : i32, i32
  }
  func.func @transform_1(%arg0: i32, %arg1: i32) -> (i32, i32) {
    %c0_i32 = arith.constant 0 : i32
    %c0_i32_0 = arith.constant 0 : i32
    %c0_i32_1 = arith.constant 0 : i32
    return %c0_i32, %c0_i32_0 : i32, i32
  }
  func.func @transform_2(%arg0: i32, %arg1: i32) -> (i32, i32) {
    %c0_i32 = arith.constant 0 : i32
    %c0_i32_0 = arith.constant 0 : i32
    %c0_i32_1 = arith.constant 0 : i32
    return %c0_i32, %c0_i32_0 : i32, i32
  }
  func.func @transform_3(%arg0: i32, %arg1: i32) -> (i32, i32) {
    %c0_i32 = arith.constant 0 : i32
    %c0_i32_0 = arith.constant 0 : i32
    %c0_i32_1 = arith.constant 0 : i32
    return %c0_i32, %c0_i32_0 : i32, i32
  }
  func.func @transform_4(%arg0: i32, %arg1: i32) -> (i32, i32) {
    %c0_i32 = arith.constant 0 : i32
    %c0_i32_0 = arith.constant 0 : i32
    %c0_i32_1 = arith.constant 0 : i32
    return %c0_i32, %c0_i32_0 : i32, i32
  }
  func.func @transform_5(%arg0: i32, %arg1: i32) -> (i32, i32) {
    %c0_i32 = arith.constant 0 : i32
    %c0_i32_0 = arith.constant 0 : i32
    return %c0_i32, %arg1 : i32, i32
  }
  func.func @transform_6(%arg0: i32, %arg1: i32) -> (i32, i32) {
    %c0_i32 = arith.constant 0 : i32
    %c0_i32_0 = arith.constant 0 : i32
    return %c0_i32, %arg1 : i32, i32
  }
  func.func @transform_7(%arg0: i32, %arg1: i32) -> (i32, i32) {
    %c0_i32 = arith.constant 0 : i32
    return %arg0, %arg1 : i32, i32
  }
}

</mosaic_0001>

<bundles_post_ra>
// kernel: tpu_custom_call.1
= control target key start
LH: loop header
LB: loop body
LE: loop exit
PB: predicated region body
PF: predicated region fallthrough
CT: control target
= control target key end

     0   :  { %12 = vsyncpa [#allocation4], 0  ;;  %s761_s0 = inlined_call_operand.hbm [shape: f32[16,128], index: 0, kind: input, shape index: {}]   ;;  %s762_s1 = inlined_call_operand.hbm [shape: f32[128,128], index: 1, kind: input, shape index: {}]   ;;  %s763_s2 = inlined_call_operand.vmem [shape: f32[1,128], index: 2, kind: input, shape index: {}]   ;;  %s764_s3 = inlined_call_operand.vmem [shape: f32[1,128], index: 3, kind: input, shape index: {}]   ;;  %s765_s4 = inlined_call_operand.vmem [shape: f32[1,128], index: 4, kind: input, shape index: {}]   ;;  %s766_s5 = inlined_call_operand.hbm [shape: f32[128,128], index: 5, kind: input, shape index: {}]   ;;  %s767_s6 = inlined_call_operand.vmem [shape: f32[1,128], index: 6, kind: input, shape index: {}]   ;;  %s768_s7 = inlined_call_operand.hbm [shape: f32[16,128], index: 7, kind: output, shape index: {}]  }
   0x1   :  { %13 = vsyncpa [#allocation7], 0 }
   0x2   :  { %14 = vsyncpa [#allocation5], 0  ;;  %s635_s24 = smov [#allocation6]   ;;  %s636_s26 = smov [#allocation3]  }
   0x3   :  { %s32_s25 = sshll.u32 %s635_s24, 4  ;;  %s20_s27 = sshll.u32 %s636_s26, 4  ;;  %s33_s25 = int_to_ptr.vmem [resolvable:$true] %s32_s25  ;;  %s682_s27 = int_to_ptr.vmem [resolvable:$true] %s20_s27 }
   0x4   :  { %s541_s30 = scalar_lea.hbm %s762_s1, 2048 }
   0x5   :  { %p542_p0 = scmp.ne.s32.totalorder %s762_s1, %s541_s30  ;;  %p545_p1 = scmp.lt.u32.totalorder %s541_s30, %s762_s1 }
   0x7   :  { %p547_p2 = pnand %p545_p1, %p542_p0 }
   0x9   :  { %550 = shalt.err (!%p547_p2)
}
   0xa   :  { %s551_s12 = scalar_lea.vmem %s33_s25, 2048  ;;  %p556_p4 = scmp.lt.s32.totalorder %s33_s25, %s33_s25 }
   0xb   :  { %p552_p3 = scmp.ne.s32.totalorder %s33_s25, %s551_s12  ;;  %p557_p5 = scmp.lt.s32.totalorder %s551_s12, %s551_s12 }
   0xd   :  { %p558_p6 = por %p557_p5, %p556_p4 }
   0xf   :  { %p559_p7 = pnand %p558_p6, %p552_p3 }
  0x11   :  { %562 = shalt.err (!%p559_p7)
}
  0x12   :  { %s637_s13 = smov 128   ;;  %s638_s14 = smov 8  }
  0x13   :  { %38 = dma.hbm_to_vmem [thread:$0]  %s762_s1, 2048, %s33_s25, [#allocation7], %s637_s13, %s637_s13, %s638_s14  }
  0x14   :  { %s563_s19 = scalar_lea.hbm %s761_s0, 256 }
  0x15   :  { %p564_p8 = scmp.ne.s32.totalorder %s761_s0, %s563_s19  ;;  %p567_p9 = scmp.lt.u32.totalorder %s563_s19, %s761_s0 }
  0x17   :  { %p569_p10 = pnand %p567_p9, %p564_p8 }
  0x19   :  { %572 = shalt.err (!%p569_p10)
}
  0x1a   :  { %s573_s24 = scalar_lea.vmem %s682_s27, 256  ;;  %p578_p12 = scmp.lt.s32.totalorder %s682_s27, %s682_s27 }
  0x1b   :  { %p574_p11 = scmp.ne.s32.totalorder %s682_s27, %s573_s24  ;;  %p579_p13 = scmp.lt.s32.totalorder %s573_s24, %s573_s24 }
  0x1d   :  { %p580_p0 = por %p579_p13, %p578_p12 }
  0x1f   :  { %p581_p1 = pnand %p580_p0, %p574_p11 }
  0x21   :  { %584 = shalt.err (!%p581_p1)
}
  0x22   :  { %26 = dma.hbm_to_vmem [thread:$0]  %s761_s0, 256, %s682_s27, [#allocation4], %s637_s13, %s637_s13, %s638_s14  }
  0x23   :  { %s639_s26 = smov [#allocation8]   ;;  %s585_s8 = scalar_lea.hbm %s766_s5, 2048 }
  0x24   :  { %s50_s28 = sshll.u32 %s639_s26, 4  ;;  %p586_p2 = scmp.ne.s32.totalorder %s766_s5, %s585_s8  ;;  %s51_s28 = int_to_ptr.vmem [resolvable:$true] %s50_s28 }
  0x25   :  { %p589_p3 = scmp.lt.u32.totalorder %s585_s8, %s766_s5 }
  0x27   :  { %p591_p4 = pnand %p589_p3, %p586_p2 }
  0x29   :  { %594 = shalt.err (!%p591_p4)
}
  0x2a   :  { %s595_s15 = scalar_lea.vmem %s51_s28, 2048  ;;  %p600_p6 = scmp.lt.s32.totalorder %s51_s28, %s51_s28 }
  0x2b   :  { %p596_p5 = scmp.ne.s32.totalorder %s51_s28, %s595_s15  ;;  %p601_p7 = scmp.lt.s32.totalorder %s595_s15, %s595_s15 }
  0x2d   :  { %p602_p8 = por %p601_p7, %p600_p6 }
  0x2f   :  { %p603_p9 = pnand %p602_p8, %p596_p5 }
  0x31   :  { %606 = shalt.err (!%p603_p9)
}
  0x32   :  { %56 = dma.hbm_to_vmem [thread:$0]  %s766_s5, 2048, %s51_s28, [#allocation7], %s637_s13, %s637_s13, %s638_s14  }
  0x33   :  { %629 = dma.done.wait [#allocation4], 256  }
  0x34   :  { %630 = vsyncadd [#allocation4], 4294967040 }
  0x35   :  { %631 = dma.done.wait [#allocation7], 4096  }
  0x36   :  { %632 = vsyncadd [#allocation7], 4294963200  ;;  %v74_v0 = vld [vmem:[#allocation6] sm:$0xff]  ;;  %v75_v1 = vld [vmem:[#allocation6 + $0x8] sm:$0xff]  ;;  %v190_v47 = vlaneseq  ;;  %v640_v51 = vmov 0.0   ;;  %s641_s22 = smov [#allocation9]  }
  0x37   :  { %v76_v2 = vld [vmem:[#allocation6 + $0x10] sm:$0xff]  ;;  %v462_v3 = vpack.c.bf16 %v75_v1, %v74_v0  ;;  %v77_v4 = vld [vmem:[#allocation6 + $0x18] sm:$0xff]  ;;  %v78_v6 = vld [vmem:[#allocation6 + $0x20] sm:$0xff]  ;;  %s338_s23 = sshll.u32 %s641_s22, 4  ;;  %s339_s23 = int_to_ptr.vmem [resolvable:$true] %s338_s23 }
  0x38   :  { %v466_v5 = vpack.c.bf16 %v77_v4, %v76_v2  ;;  %v79_v7 = vld [vmem:[#allocation6 + $0x28] sm:$0xff]  ;;  %v72_v9 = vld [vmem:[#allocation3] sm:$0xff]  ;;  %v81_v11 = vld [vmem:[#allocation6 + $0x38] sm:$0xff]  ;;  %v191_v48 = vand.u32 127, %v190_v47  ;;  %p612_p11 = scmp.lt.s32.totalorder %s339_s23, %s339_s23 }
  0x39   :  { %463 = vmatprep.subr.bf16.mxu0 %v462_v3  ;;  %v470_v8 = vpack.c.bf16 %v79_v7, %v78_v6  ;;  %v80_v10 = vld [vmem:[#allocation6 + $0x30] sm:$0xff]  ;;  %424 = vmatprep.mubr.f32.mxu0 %v72_v9  ;;  %v82_v13 = vld [vmem:[#allocation6 + $0x40] sm:$0xff]  ;;  %v83_v14 = vld [vmem:[#allocation6 + $0x48] sm:$0xff] }
  0x3a   :  { %465 = vmatpush3.bf16.msra.mxu0 %v462_v3  ;;  %v474_v12 = vpack.c.bf16 %v81_v11, %v80_v10  ;;  %v478_v15 = vpack.c.bf16 %v83_v14, %v82_v13  ;;  %v84_v16 = vld [vmem:[#allocation6 + $0x50] sm:$0xff]  ;;  %v85_v17 = vld [vmem:[#allocation6 + $0x58] sm:$0xff]  ;;  %v86_v19 = vld [vmem:[#allocation6 + $0x60] sm:$0xff]  ;;  %vm192_vm0 = vcmp.lt.s32.totalorder %v191_v48, 32 }
  0x3b   :  { %467 = vmatprep.subr.bf16.mxu0 %v466_v5  ;;  %v482_v18 = vpack.c.bf16 %v85_v17, %v84_v16  ;;  %v87_v20 = vld [vmem:[#allocation6 + $0x68] sm:$0xff]  ;;  %v88_v22 = vld [vmem:[#allocation6 + $0x70] sm:$0xff]  ;;  %v89_v23 = vld [vmem:[#allocation6 + $0x78] sm:$0xff]  ;;  %v352_v52 = vsel %vm192_vm0, 1.0, %v640_v51 }
  0x3c   :  { %v486_v21 = vpack.c.bf16 %v87_v20, %v86_v19  ;;  %v490_v24 = vpack.c.bf16 %v89_v23, %v88_v22  ;;  %v73_v25 = vld [vmem:[#allocation3 + $0x8] sm:$0xff]  ;;  %v351_v26 = vld [vmem:[%s763_s2] ss:$0 sm:$0xff]  ;;  %v233_v41 = vld [vmem:[#allocation8] sm:$0xff] }
  0x3d   :  { %v234_v42 = vld [vmem:[#allocation8 + $0x8] sm:$0xff]  ;;  %v235_v43 = vld [vmem:[#allocation8 + $0x10] sm:$0xff]  ;;  %v236_v45 = vld [vmem:[#allocation8 + $0x18] sm:$0xff] }
  0x3e   :  { %469 = vmatpush3.bf16.msra.mxu0 %v466_v5  ;;  %v494_v44 = vpack.c.bf16 %v234_v42, %v233_v41  ;;  %v498_v46 = vpack.c.bf16 %v236_v45, %v235_v43  ;;  %v237_v61 = vld [vmem:[#allocation8 + $0x20] sm:$0xff]  ;;  %v238_v62 = vld [vmem:[#allocation8 + $0x28] sm:$0xff]  ;;  %v239_v0 = vld [vmem:[#allocation8 + $0x30] sm:$0xff] }
  0x3f   :  { %471 = vmatprep.subr.bf16.mxu0 %v470_v8  ;;  %v502_v63 = vpack.c.bf16 %v238_v62, %v237_v61  ;;  %v240_v1 = vld [vmem:[#allocation8 + $0x38] sm:$0xff]  ;;  %v241_v3 = vld [vmem:[#allocation8 + $0x40] sm:$0xff]  ;;  %v242_v4 = vld [vmem:[#allocation8 + $0x48] sm:$0xff] }
  0x40   :  { %495 = vmatprep.subr.bf16.mxu1 %v494_v44  ;;  %v506_v2 = vpack.c.bf16 %v240_v1, %v239_v0  ;;  %v510_v5 = vpack.c.bf16 %v242_v4, %v241_v3  ;;  %v243_v6 = vld [vmem:[#allocation8 + $0x50] sm:$0xff]  ;;  %v244_v7 = vld [vmem:[#allocation8 + $0x58] sm:$0xff]  ;;  %v246_v10 = vld [vmem:[#allocation8 + $0x68] sm:$0xff] }
  0x41   :  { %497 = vmatpush3.bf16.msra.mxu1 %v494_v44  ;;  %v514_v9 = vpack.c.bf16 %v244_v7, %v243_v6  ;;  %v248_v13 = vld [vmem:[#allocation8 + $0x78] sm:$0xff]  ;;  %v353_v22 = vld [vmem:[%s764_s3] ss:$0 sm:$0xff]  ;;  %s607_s3 = scalar_lea.vmem %s339_s23, 256 }
  0x42   :  { %473 = vmatpush3.bf16.msra.mxu0 %v470_v8  ;;  %499 = vmatprep.subr.bf16.mxu1 %v498_v46  ;;  %v245_v8 = vld [vmem:[#allocation8 + $0x60] sm:$0xff]  ;;  %p608_p10 = scmp.ne.s32.totalorder %s339_s23, %s607_s3  ;;  %p613_p12 = scmp.lt.s32.totalorder %s607_s3, %s607_s3 }
  0x43   :  { %475 = vmatprep.subr.bf16.mxu0 %v474_v12  ;;  %v518_v11 = vpack.c.bf16 %v246_v10, %v245_v8 }
  0x44   :  { %p614_p13 = por %p613_p12, %p612_p11 }
  0x45   :  { %501 = vmatpush3.bf16.msra.mxu1 %v498_v46 }
  0x46   :  { %477 = vmatpush3.bf16.msra.mxu0 %v474_v12  ;;  %503 = vmatprep.subr.bf16.mxu1 %v502_v63  ;;  %v247_v12 = vld [vmem:[#allocation8 + $0x70] sm:$0xff]  ;;  %p615_p0 = pnand %p614_p13, %p608_p10 }
  0x47   :  { %479 = vmatprep.subr.bf16.mxu0 %v478_v15  ;;  %v522_v14 = vpack.c.bf16 %v248_v13, %v247_v12 }
  0x49   :  { %505 = vmatpush3.bf16.msra.mxu1 %v502_v63 }
  0x4a   :  { %481 = vmatpush3.bf16.msra.mxu0 %v478_v15  ;;  %507 = vmatprep.subr.bf16.mxu1 %v506_v2 }
  0x4b   :  { %483 = vmatprep.subr.bf16.mxu0 %v482_v18 }
  0x4d   :  { %509 = vmatpush3.bf16.msra.mxu1 %v506_v2 }
  0x4e   :  { %485 = vmatpush3.bf16.msra.mxu0 %v482_v18  ;;  %511 = vmatprep.subr.bf16.mxu1 %v510_v5 }
  0x4f   :  { %487 = vmatprep.subr.bf16.mxu0 %v486_v21 }
  0x51   :  { %513 = vmatpush3.bf16.msra.mxu1 %v510_v5 }
  0x52   :  { %489 = vmatpush3.bf16.msra.mxu0 %v486_v21  ;;  %515 = vmatprep.subr.bf16.mxu1 %v514_v9 }
  0x53   :  { %491 = vmatprep.subr.bf16.mxu0 %v490_v24 }
  0x55   :  { %517 = vmatpush3.bf16.msra.mxu1 %v514_v9 }
  0x56   :  { %493 = vmatpush3.bf16.msra.mxu0 %v490_v24  ;;  %519 = vmatprep.subr.bf16.mxu1 %v518_v11  ;;  %v354_v24 = vld [vmem:[%s765_s4] ss:$0 sm:$0xff] }
  0x59   :  { %425 = vmatmul.mubr.f32.vlgmr.msra.gmra.mrb[0].mxu0 %v73_v25  ;;  %521 = vmatpush3.bf16.msra.mxu1 %v518_v11 }
  0x5a   :  { %523 = vmatprep.subr.bf16.mxu1 %v522_v14 }
  0x5d   :  { %525 = vmatpush3.bf16.msra.mxu1 %v522_v14 }
 0x12c   :  { %v426_v27 = vpop.f32.mrb[0].mxu0 }
 0x12d   :  { %v169_v28 = vadd.f32 %v426_v27, %v351_v26  ;;  %v163_v29 = vpop.f32.mrb[1].mxu0 }
 0x12e   :  { %v164_v30 = vadd.f32 %v351_v26, %v163_v29 }
 0x12f   :  { %v175_v31 = vmul.f32 0.70710677, %v169_v28  ;;  %v173_v39 = vmul.f32 0.5, %v169_v28 }
 0x130   :  { %v174_v32 = vmul.f32 0.70710677, %v164_v30  ;;  %v172_v35 = vmul.f32 0.5, %v164_v30 }
 0x131   :  { %533 = verf.f32 %v175_v31  ;;  %v355_v31 = vld [vmem:[%s767_s6] ss:$0 sm:$0xff] }
 0x132   :  { %535 = verf.f32 %v174_v32 }
 0x13b   :  { %v534_v33 = vpop.eup %533 }
 0x13c   :  { %v536_v34 = vpop.eup %535  ;;  %v179_v38 = vadd.f32 1.0, %v534_v33 }
 0x13d   :  { %v178_v36 = vadd.f32 1.0, %v536_v34 }
 0x13e   :  { %v181_v40 = vmul.f32 %v179_v38, %v173_v39 }
 0x13f   :  { %v180_v37 = vmul.f32 %v178_v36, %v172_v35 }
 0x141   :  { %182 = vadd.xlane.f32.xlu0 %v180_v37 }
 0x145   :  { %184 = vadd.xlane.f32.xlu0 %v181_v40 }
 0x1ce   :  { %v183_v49 = vpop.xlane.xlu0 %182 }
 0x1cf   :  { %v186_v50 = vmul.f32 0.03125, %v183_v49 }
 0x1d1   :  { %v188_v53 = vsub.f32 %v180_v37, %v186_v50 }
 0x1d2   :  { %v185_v54 = vpop.xlane.xlu0 %184 }
 0x1d3   :  { %v187_v55 = vmul.f32 0.03125, %v185_v54  ;;  %v195_v56 = vmul.f32 %v352_v52, %v188_v53 }
 0x1d5   :  { %v189_v57 = vsub.f32 %v181_v40, %v187_v55  ;;  %v197_v58 = vmul.f32 %v195_v56, %v195_v56 }
 0x1d7   :  { %199 = vadd.xlane.f32.xlu1 %v197_v58  ;;  %v196_v59 = vmul.f32 %v352_v52, %v189_v57 }
 0x1d9   :  { %v198_v60 = vmul.f32 %v196_v59, %v196_v59 }
 0x1db   :  { %201 = vadd.xlane.f32.xlu1 %v198_v60 }
 0x264   :  { %v200_v15 = vpop.xlane.xlu1 %199 }
 0x265   :  { %v203_v16 = vmul.f32 0.03125, %v200_v15 }
 0x267   :  { %v205_v17 = vadd.f32 1e-12, %v203_v16 }
 0x268   :  { %v202_v18 = vpop.xlane.xlu1 %201 }
 0x269   :  { %537 = vrsqrt.f32 %v205_v17  ;;  %v204_v19 = vmul.f32 0.03125, %v202_v18 }
 0x26b   :  { %v206_v20 = vadd.f32 1e-12, %v204_v19 }
 0x26d   :  { %539 = vrsqrt.f32 %v206_v20 }
 0x273   :  { %v538_v21 = vpop.eup %537 }
 0x274   :  { %v209_v23 = vmul.f32 %v538_v21, %v195_v56 }
 0x276   :  { %v218_v25 = vmul.f32 %v353_v22, %v209_v23 }
 0x277   :  { %v540_v26 = vpop.eup %539 }
 0x278   :  { %v210_v27 = vmul.f32 %v540_v26, %v196_v59  ;;  %v227_v28 = vadd.f32 %v354_v24, %v218_v25 }
 0x27a   :  { %v219_v29 = vmul.f32 %v353_v22, %v210_v27  ;;  %459 = vmatprep.mubr.f32.mxu1 %v227_v28 }
 0x27c   :  { %v228_v30 = vadd.f32 %v354_v24, %v219_v29 }
 0x27e   :  { %460 = vmatmul.mubr.f32.vlgmr.msra.gmra.mrb[0].mxu1 %v228_v30 }
 0x351   :  { %v461_v32 = vpop.f32.mrb[0].mxu1 }
 0x352   :  { %v328_v33 = vadd.f32 %v461_v32, %v355_v31  ;;  %v322_v34 = vpop.f32.mrb[1].mxu1 }
 0x353   :  { %v323_v35 = vadd.f32 %v355_v31, %v322_v34 }
 0x354   :  { %332 = vst [vmem:[#allocation9 + $0x8] sm:$0xff] %v328_v33 }
 0x355   :  { %331 = vst [vmem:[#allocation9] sm:$0xff] %v323_v35 }
 0x356   :  { %618 = shalt.err (!%p615_p0)
}
 0x357   :  { %s619_s6 = scalar_lea.hbm %s768_s7, 256 }
 0x358   :  { %p620_p1 = scmp.ne.s32.totalorder %s768_s7, %s619_s6  ;;  %p623_p2 = scmp.lt.u32.totalorder %s619_s6, %s768_s7 }
 0x35a   :  { %p625_p3 = pnand %p623_p2, %p620_p1 }
 0x35c   :  { %628 = shalt.err (!%p625_p3)
}
 0x35d   :  { %344 = dma.vmem_to_hbm [thread:$0]  %s339_s23, 256, %s768_s7, [#allocation5], %s637_s13, %s637_s13, %s638_s14  }
 0x35e   :  { %633 = dma.done.wait [#allocation5], 256  }
 0x35f   :  { %634 = vsyncadd [#allocation5], 4294967040 }
 0x360   :  { %348 = vsyncpa [#allocation4], 1 }
 0x361   :  { %349 = vsyncpa [#allocation7], 1 }
 0x362   :  { %350 = vsyncpa [#allocation5], 1 }

</bundles_post_ra>
